<compile_context>
chip_gen: v7x
topology: tpu7x:2x2x1
jax: 0.10.0
libtpu: 0.0.40
codegen_flags: <defaults>
</compile_context>

<pallas_src>
import math

import jax
import jax.numpy as jnp
from jax.experimental import pallas as pl
from jax.experimental.pallas import tpu as pltpu


def make_positional_encoding_table(max_len, d_model, dtype=jnp.float32):
    """Sinusoidal PE table, identical to the PyTorch buffer: (max_len, d_model)."""
    position = jnp.arange(max_len, dtype=jnp.float32)[:, None]            # (L, 1)
    div_term = jnp.exp(
        jnp.arange(0, d_model, 2, dtype=jnp.float32) * (-math.log(10000.0) / d_model)
    )                                                                      # (d_model/2,)
    pe = jnp.zeros((max_len, d_model), dtype=jnp.float32)
    pe = pe.at[:, 0::2].set(jnp.sin(position * div_term))
    pe = pe.at[:, 1::2].set(jnp.cos(position * div_term))
    return pe.astype(dtype)


def _pe_add_kernel(x_ref, pe_ref, o_ref):
    # x_ref / pe_ref / o_ref: (ts, D)  (batch dim squeezed away by the BlockSpec)
    # Add in f32 (matches PyTorch's f32 buffer), cast back to the output dtype.
    # TODO(synk): training-mode dropout (p > 0) would use pltpu.prng_seed +
    #             pltpu.stateful_bernoulli; forward here is eval-mode identity.
    o_ref[...] = (x_ref[...].astype(jnp.float32) + pe_ref[...].astype(jnp.float32)
                  ).astype(o_ref.dtype)


def _vmem_capacity_bytes():
    """Per-core VMEM capacity; conservative v7x fallback if the query fails."""
    try:
        return int(pltpu.get_tpu_info().vmem_capacity_bytes)
    except Exception:
        return 64 << 20


def _pick_seq_tile(S, D, itemsize, budget):
    """Largest multiple-of-8 tile whose x slab stays under `budget` bytes."""
    for t in (2048, 1024, 512, 256, 128, 64, 32, 16, 8):
        if t <= S and t * D * itemsize <= budget:
            return t
    return S  # tiny S: one full-extent block (always legal)


def positional_encoding(x, pe, *, seq_tile=None, donate_x=False):
    """x: (batch, seq, d_model);  pe: (max_len, d_model) with max_len >= seq."""
    batch, seq, d_model = x.shape
    assert seq <= pe.shape[0], "sequence length exceeds the PE table's max_len"
    assert pe.shape[1] == d_model, "pe / x d_model mismatch"

    x_item = x.dtype.itemsize
    pe_item = pe.dtype.itemsize

    pe_seq = pe[:seq]  # (seq, d_model) — static slice under jit

    # Lane-dense fold: make the last dim a multiple of 128 when possible.
    fold = 1
    if d_model % 128 != 0:
        k = math.lcm(d_model, 128) // d_model
        if k <= seq and seq % k == 0:
            fold = k
        # TODO(synk): ragged seq with tiny d_model falls back to the original
        #             (masked-store) layout; still correct, just slower.
    S = seq // fold
    D = d_model * fold
    x2 = x.reshape(batch, S, D) if fold > 1 else x
    pe2 = pe_seq.reshape(S, D) if fold > 1 else pe_seq

    # Tile sizing from real VMEM capacity (v5e/v6e: 128 MiB, v7x: 64 MiB/TC).
    capacity = _vmem_capacity_bytes()
    x_tile_budget = min(8 << 20, max(1 << 20, capacity // 16))
    ts = seq_tile if seq_tile is not None else _pick_seq_tile(S, D, x_item, x_tile_budget)
    n_seq_tiles = (S + ts - 1) // ts  # cdiv: partial last block is fine

    # Grid ordering: seq outer when it has >=2 tiles (pe re-fetched only on a
    # seq-tile change); batch outer otherwise so the outer parallel axis still
    # has extent >= 2 for v7x megacore sharding (pe index is then constant).
    seq_outer = n_seq_tiles > 1
    if seq_outer:
        grid = (n_seq_tiles, batch)
        x_map = lambda s, b: (b, s, 0)
        pe_map = lambda s, b: (s, 0)
    else:
        grid = (batch, n_seq_tiles)
        x_map = lambda b, s: (b, s, 0)
        pe_map = lambda b, s: (s, 0)

    # Peak VMEM: double-buffered x + out (x dtype) + pe (pe dtype) + headroom.
    tile_elems = ts * D
    needed = 2 * tile_elems * (2 * x_item + pe_item) + (4 << 20)
    vmem_limit = int(min(capacity, max(needed, 16 << 20)))

    cost = pl.CostEstimate(
        flops=batch * seq * d_model,           # one add per element
        transcendentals=0,
        bytes_accessed=2 * batch * seq * d_model * x_item + seq * d_model * pe_item,
    )

    out = pl.pallas_call(
        _pe_add_kernel,
        out_shape=jax.ShapeDtypeStruct((batch, S, D), x.dtype),
        grid_spec=pltpu.PrefetchScalarGridSpec(
            num_scalar_prefetch=0,
            grid=grid,
            in_specs=[
                # x: (batch, S, D) -> kernel sees (ts, D), lane-dense
                pl.BlockSpec((None, ts, D), x_map),
                # pe: (S, D) -> block index depends on the seq tile only
                pl.BlockSpec((ts, D), pe_map),
            ],
            out_specs=pl.BlockSpec((None, ts, D), x_map),
        ),
        compiler_params=pltpu.CompilerParams(
            dimension_semantics=("parallel", "parallel"),  # megacore-shardable
            vmem_limit_bytes=vmem_limit,
        ),
        cost_estimate=cost,
        input_output_aliases=({0: 0} if donate_x else {}),
    )(x2, pe2)

    return out.reshape(batch, seq, d_model) if fold > 1 else out


if __name__ == "__main__":
    # Small shapes consistent with the module: batch=2, seq=8, d_model=32.
    batch, seq, d_model, max_len = 2, 8, 32, 64
    dropout_p = 0.0  # eval-mode / p=0.0 -> dropout is the identity

    key = jax.random.PRNGKey(0)
    x = jax.random.normal(key, (batch, seq, d_model), dtype=jnp.float32)

    pe = make_positional_encoding_table(max_len, d_model)  # (max_len, d_model) f32

    out = jax.jit(positional_encoding)(x, pe)
    jax.block_until_ready(out)

    # Reference check against plain JAX (same math as the PyTorch forward).
    ref = x + pe[None, :seq, :]
    assert out.shape == (batch, seq, d_model)
    assert jnp.allclose(out, ref, atol=1e-6, rtol=1e-6), "mismatch vs reference"

    print("KERNEL_OK")
</pallas_src>

<mosaic_0001>
module attributes {stable_mosaic.version = 11 : i64} {
  func.func @_pe_add_kernel(%arg0: i32, %arg1: i32, %arg2: memref<1x2x128xf32, #tpu.memory_space<vmem>>, %arg3: memref<2x128xf32, #tpu.memory_space<vmem>>, %arg4: memref<1x2x128xf32, #tpu.memory_space<vmem>>) attributes {dimension_semantics = [#tpu.dimension_semantics<parallel>, #tpu.dimension_semantics<parallel>], iteration_bounds = array<i64: 2, 1>, scalar_prefetch = 0 : i64, scratch_operands = 0 : i64, tpu.core_type = #tpu.core_type<tc>, window_params = [{transform_indices = @transform_0, window_bounds = array<i64: 1, 2, 128>}, {transform_indices = @transform_1, window_bounds = array<i64: 2, 128>}, {transform_indices = @transform_2, window_bounds = array<i64: 1, 2, 128>}]} {
    %c0 = arith.constant 0 : index
    %c0_0 = arith.constant 0 : index
    %c0_1 = arith.constant 0 : index
    %0 = vector.load %arg2[%c0, %c0_0, %c0_1] : memref<1x2x128xf32, #tpu.memory_space<vmem>>, vector<1x2x128xf32>
    %1 = vector.shape_cast %0 : vector<1x2x128xf32> to vector<2x128xf32>
    %c0_2 = arith.constant 0 : index
    %c0_3 = arith.constant 0 : index
    %2 = vector.load %arg3[%c0_2, %c0_3] : memref<2x128xf32, #tpu.memory_space<vmem>>, vector<2x128xf32>
    %3 = arith.addf %1, %2 : vector<2x128xf32>
    %c0_4 = arith.constant 0 : index
    %c0_5 = arith.constant 0 : index
    %c0_6 = arith.constant 0 : index
    %4 = vector.load %arg4[%c0_4, %c0_5, %c0_6] : memref<1x2x128xf32, #tpu.memory_space<vmem>>, vector<1x2x128xf32>
    %5 = vector.shape_cast %4 : vector<1x2x128xf32> to vector<2x128xf32>
    %6 = vector.shape_cast %3 : vector<2x128xf32> to vector<1x2x128xf32>
    tpu.vector_store %arg4[%c0_4, %c0_5, %c0_6], %6 {strides = array<i32>} : memref<1x2x128xf32, #tpu.memory_space<vmem>>, vector<1x2x128xf32>,
    return
  }
  func.func @transform_0(%arg0: i32, %arg1: i32) -> (i32, i32, i32) {
    %c0_i32 = arith.constant 0 : i32
    %c0_i32_0 = arith.constant 0 : i32
    return %arg0, %arg1, %c0_i32 : i32, i32, i32
  }
  func.func @transform_1(%arg0: i32, %arg1: i32) -> (i32, i32) {
    %c0_i32 = arith.constant 0 : i32
    %c0_i32_0 = arith.constant 0 : i32
    return %arg1, %c0_i32 : i32, i32
  }
  func.func @transform_2(%arg0: i32, %arg1: i32) -> (i32, i32, i32) {
    %c0_i32 = arith.constant 0 : i32
    %c0_i32_0 = arith.constant 0 : i32
    return %arg0, %arg1, %c0_i32 : i32, i32, i32
  }
}

</mosaic_0001>

<bundles_post_ra>
// kernel: positional_encoding.1
= control target key start
LH: loop header
LB: loop body
LE: loop exit
PB: predicated region body
PF: predicated region fallthrough
CT: control target
= control target key end

     0   :  { %s354_s9 = smov 0   ;;  %s331_s10 = smov 0   ;;  %s368_s0 = inlined_call_operand.vmem [shape: f32[2,2,128], index: 0, kind: input, shape index: {}]   ;;  %s369_s1 = inlined_call_operand.vmem [shape: f32[2,128], index: 1, kind: input, shape index: {}]   ;;  %s370_s2 = inlined_call_operand.vmem [shape: f32[2,2,128], index: 2, kind: output, shape index: {}]  }
   0x1   :  { %s335_s11 = smov 0  }
   0x2 LB: > { %s24_s12 = sadd.s32 1, %s333_s10  ;;  %p286_p0 = scmp.ge.s32.totalorder %s337_s11, 1  ;;  %s337_s11 = sphi %s335_s11, %s12_s11   ;;  %s333_s10 = sphi %s331_s10, %s332_s10   ;;  %s329_s9 = sphi %s354_s9, %s371_s9  }
   0x3   : > { %p26_p1 = scmp.ge.s32.totalorder %s24_s12, 2  ;;  %p139_p2 = scmp.lt.s32.totalorder %s337_s11, 3 }
   0x5   : > { %s373_s12 = smov (%p26_p1, %s24_s12), 0  ;;  %p140_p3 = pnand %p286_p0, %p139_p2 }
   0x6   : > { %p169_p4 = scmp.lt.s32.totalorder (!%p140_p3), %s329_s9, 1  ;;  %v188_v0 = vld [vmem:[%s369_s1] sm:$0x3] (!%p140_p3) }
   0x7   : > { %143 = sbr.rel (%p140_p3) target bundleno = 21 (0x15), region = 28 }
   0xe   : > { %s375_s9 = smov (!%p169_p4, %s329_s9), 1 }
   0xf   : > { %s287_s13 = sshll.u32 %s375_s9, 1 }
  0x10   : > { %s175_s18 = scalar_lea.vmem %s368_s0, %s287_s13  ;;  %s186_s21 = scalar_lea.vmem %s370_s2, %s287_s13 }
  0x11   : > { %v187_v1 = vld [vmem:[%s175_s18] sm:$0x3] }
  0x12   : > { %v189_v2 = vadd.f32 %v188_v0, %v187_v1 }
  0x14   : > { %190 = vst [vmem:[%s186_s21] sm:$0x3] %v189_v2 }
  0x15 PF: > { %s12_s11 = sadd.s32 1, %s337_s11   ;;  %s371_s9 = smov %s333_s10 }
  0x16   : > { %p9_p5 = scmp.ge.s32.totalorder %s12_s11, 4   ;;  %s332_s10 = smov %s373_s12  }
  0x18   :  { %11 = sbr.rel (!%p9_p5) target bundleno = 2 (0x2), region = 61 }

</bundles_post_ra>
